<compile_context>
chip_gen: v7x
topology: tpu7x:2x2x1
jax: 0.10.0
libtpu: 0.0.40
codegen_flags: <defaults>
</compile_context>

<pallas_src>
import functools

import jax
import jax.numpy as jnp
from jax.experimental import pallas as pl
from jax.experimental.pallas import tpu as pltpu


def _triplet_kernel(anc_ref, pos_ref, neg_ref, psum_ref, pcnt_ref, *,
                    alpha, block_b, tiles_per_core, batch):
    c = pl.program_id(0)          # core-split axis ("parallel")
    i = pl.program_id(1)          # batch-tile reduction axis ("arbitrary")

    # Zero the per-core resident accumulators at the start of each core's sweep.
    @pl.when(i == 0)
    def _():
        psum_ref[...] = jnp.zeros_like(psum_ref)
        pcnt_ref[...] = jnp.zeros_like(pcnt_ref)

    a = anc_ref[...].astype(jnp.float32)
    p = pos_ref[...].astype(jnp.float32)
    n = neg_ref[...].astype(jnp.float32)

    dp = a - p
    dn = a - n
    pos_dist = jnp.sqrt(jnp.sum(dp * dp, axis=1, keepdims=True))   # (TB, 1)
    neg_dist = jnp.sqrt(jnp.sum(dn * dn, axis=1, keepdims=True))   # (TB, 1)
    margin = pos_dist - neg_dist + jnp.float32(alpha)               # (TB, 1)

    # Mask rows past the real batch (partial last tile / phantom tile when the
    # number of tiles is odd and split across two cores).
    tile = c * tiles_per_core + i
    rows = jax.lax.broadcasted_iota(jnp.int32, margin.shape, 0) + tile * block_b
    hard = jnp.logical_and(margin > 0.0, rows < batch)              # (TB, 1) bool

    contrib = jnp.where(hard, margin, jnp.float32(0.0))             # (TB, 1)
    # Per-tile scalar partial sums; counts kept in f32 (exact for B < 2**24).
    psum_ref[...] += jnp.sum(contrib, keepdims=True)[None]          # (1, 1, 1)
    pcnt_ref[...] += jnp.sum(hard.astype(jnp.float32), keepdims=True)[None]


def _choose_block_b(batch, d, itemsize, requested=None):
    """Largest batch tile keeping 3 inputs x 2 pipeline buffers ~<= 20 MiB."""
    if requested is None:
        budget = 20 * 1024 * 1024
        tb = budget // (6 * d * itemsize)
        tb = int(min(tb, 2048, batch))
    else:
        tb = int(min(requested, batch))
    if tb >= batch:
        return batch                          # full-dim block is always legal
    return max(8, (tb // 8) * 8)              # 8-row sublane alignment


def triplet_loss(anc, pos, neg, alpha, *, block_b=None):
    B, D = anc.shape
    itemsize = jnp.dtype(anc.dtype).itemsize
    tb = _choose_block_b(B, D, itemsize, block_b)

    n_tiles = pl.cdiv(B, tb)
    num_cores = 2 if n_tiles >= 2 else 1      # v7x: shard batch over both TCs
    tiles_per_core = pl.cdiv(n_tiles, num_cores)

    def in_map(c, i):
        # Clamp so a phantom trailing tile re-reads the last real tile; its
        # contribution is masked out inside the kernel by the row-index check.
        t = jnp.minimum(c * tiles_per_core + i, n_tiles - 1)
        return (t, 0)

    out_map = lambda c, i: (c, 0, 0)

    kernel = functools.partial(
        _triplet_kernel, alpha=float(alpha), block_b=tb,
        tiles_per_core=tiles_per_core, batch=B)

    psum, pcnt = pl.pallas_call(
        kernel,
        out_shape=(
            jax.ShapeDtypeStruct((num_cores, 1, 1), jnp.float32),
            jax.ShapeDtypeStruct((num_cores, 1, 1), jnp.float32),
        ),
        grid_spec=pltpu.PrefetchScalarGridSpec(
            num_scalar_prefetch=0,
            grid=(num_cores, tiles_per_core),
            in_specs=[
                pl.BlockSpec((tb, D), in_map),
                pl.BlockSpec((tb, D), in_map),
                pl.BlockSpec((tb, D), in_map),
            ],
            out_specs=(
                pl.BlockSpec((1, 1, 1), out_map),
                pl.BlockSpec((1, 1, 1), out_map),
            ),
        ),
        compiler_params=pltpu.CompilerParams(
            dimension_semantics=("parallel", "arbitrary"),
            vmem_limit_bytes=32 * 1024 * 1024,
        ),
    )(anc, pos, neg)

    # Tiny XLA epilogue: cross-core reduce + final division.
    cnt_f = jnp.sum(pcnt)
    num_hard = cnt_f.astype(jnp.int32)
    loss = jnp.sum(psum) / jnp.maximum(jnp.float32(1.0), cnt_f)
    return loss, num_hard


def _reference(anc, pos, neg, alpha):
    """Pure-JAX reference mirroring the PyTorch forward (f32 math)."""
    anc = anc.astype(jnp.float32)
    pos = pos.astype(jnp.float32)
    neg = neg.astype(jnp.float32)
    pos_dist = jnp.sqrt(jnp.sum((anc - pos) ** 2, axis=1))
    neg_dist = jnp.sqrt(jnp.sum((anc - neg) ** 2, axis=1))
    margin = pos_dist - neg_dist + alpha
    hard = margin > 0
    num_hard = jnp.sum(hard)
    loss = jnp.sum(jnp.where(hard, margin, 0.0)) / jnp.maximum(1, num_hard)
    return loss, num_hard


def _make_inputs(key, B, D, dtype=jnp.float32):
    k1, k2, k3 = jax.random.split(key, 3)
    anc = jax.random.normal(k1, (B, D), dtype=jnp.float32)
    pos = anc + 0.1 * jax.random.normal(k2, (B, D), dtype=jnp.float32)
    neg = jax.random.normal(k3, (B, D), dtype=jnp.float32)
    return anc.astype(dtype), pos.astype(dtype), neg.astype(dtype)


def _check(anc, pos, neg, alpha, **kw):
    loss, cnt = triplet_loss(anc, pos, neg, alpha, **kw)
    loss = jax.block_until_ready(loss)
    cnt = jax.block_until_ready(cnt)
    ref_loss, ref_cnt = _reference(anc, pos, neg, alpha)
    assert jnp.allclose(loss, ref_loss, atol=1e-5, rtol=1e-5), (loss, ref_loss)
    assert int(cnt) == int(ref_cnt), (cnt, ref_cnt)


if __name__ == "__main__":
    alpha = 0.2

    # 1) Small single-tile path (B=8, D=32).
    anc, pos, neg = _make_inputs(jax.random.PRNGKey(0), 8, 32)
    _check(anc, pos, neg, alpha)

    # 2) Multi-tile + dual-core split with an odd tile count (phantom tile).
    anc, pos, neg = _make_inputs(jax.random.PRNGKey(1), 24, 32)
    _check(anc, pos, neg, alpha, block_b=8)

    # 3) Ragged batch: partial last tile masked by global row index.
    anc, pos, neg = _make_inputs(jax.random.PRNGKey(2), 13, 32)
    _check(anc, pos, neg, alpha, block_b=8)

    # 4) bf16 streaming (halved HBM bytes), f32 math inside the kernel.
    anc, pos, neg = _make_inputs(jax.random.PRNGKey(3), 16, 128, dtype=jnp.bfloat16)
    _check(anc, pos, neg, alpha)

    print("KERNEL_OK")
</pallas_src>

<mosaic_0001>
module attributes {stable_mosaic.version = 11 : i64} {
  func.func @_triplet_kernel(%arg0: i32, %arg1: i32, %arg2: memref<8x32xf32, #tpu.memory_space<vmem>>, %arg3: memref<8x32xf32, #tpu.memory_space<vmem>>, %arg4: memref<8x32xf32, #tpu.memory_space<vmem>>, %arg5: memref<1x1x1xf32, #tpu.memory_space<vmem>>, %arg6: memref<1x1x1xf32, #tpu.memory_space<vmem>>) attributes {dimension_semantics = [#tpu.dimension_semantics<parallel>, #tpu.dimension_semantics<arbitrary>], iteration_bounds = array<i64: 1, 1>, scalar_prefetch = 0 : i64, scratch_operands = 0 : i64, tpu.core_type = #tpu.core_type<tc>, window_params = [{transform_indices = @transform_0, window_bounds = array<i64: 8, 32>}, {transform_indices = @transform_1, window_bounds = array<i64: 8, 32>}, {transform_indices = @transform_2, window_bounds = array<i64: 8, 32>}, {transform_indices = @transform_3, window_bounds = array<i64: 1, 1, 1>}, {transform_indices = @transform_4, window_bounds = array<i64: 1, 1, 1>}]} {
    %c0_i32 = arith.constant 0 : i32
    %0 = arith.cmpi eq, %arg1, %c0_i32 : i32
    %1 = arith.extui %0 : i1 to i32
    %c0_i32_0 = arith.constant 0 : i32
    %2 = arith.cmpi ne, %1, %c0_i32_0 : i32
    scf.if %2 {
      %cst_25 = arith.constant 0.000000e+00 : f32
      %52 = vector.broadcast %cst_25 : f32 to vector<1x1x1xf32>
      %c0_26 = arith.constant 0 : index
      %c0_27 = arith.constant 0 : index
      %c0_28 = arith.constant 0 : index
      %53 = vector.load %arg5[%c0_26, %c0_27, %c0_28] : memref<1x1x1xf32, #tpu.memory_space<vmem>>, vector<1x1x1xf32>
      tpu.vector_store %arg5[%c0_26, %c0_27, %c0_28], %52 {strides = array<i32>} : memref<1x1x1xf32, #tpu.memory_space<vmem>>, vector<1x1x1xf32>,
      %cst_29 = arith.constant 0.000000e+00 : f32
      %54 = vector.broadcast %cst_29 : f32 to vector<1x1x1xf32>
      %c0_30 = arith.constant 0 : index
      %c0_31 = arith.constant 0 : index
      %c0_32 = arith.constant 0 : index
      %55 = vector.load %arg6[%c0_30, %c0_31, %c0_32] : memref<1x1x1xf32, #tpu.memory_space<vmem>>, vector<1x1x1xf32>
      tpu.vector_store %arg6[%c0_30, %c0_31, %c0_32], %54 {strides = array<i32>} : memref<1x1x1xf32, #tpu.memory_space<vmem>>, vector<1x1x1xf32>,
    } else {
    }
    %c0 = arith.constant 0 : index
    %c0_1 = arith.constant 0 : index
    %3 = vector.load %arg2[%c0, %c0_1] : memref<8x32xf32, #tpu.memory_space<vmem>>, vector<8x32xf32>
    %c0_2 = arith.constant 0 : index
    %c0_3 = arith.constant 0 : index
    %4 = vector.load %arg3[%c0_2, %c0_3] : memref<8x32xf32, #tpu.memory_space<vmem>>, vector<8x32xf32>
    %c0_4 = arith.constant 0 : index
    %c0_5 = arith.constant 0 : index
    %5 = vector.load %arg4[%c0_4, %c0_5] : memref<8x32xf32, #tpu.memory_space<vmem>>, vector<8x32xf32>
    %6 = arith.subf %3, %4 : vector<8x32xf32>
    %7 = arith.subf %3, %5 : vector<8x32xf32>
    %8 = arith.mulf %6, %6 : vector<8x32xf32>
    %cst = arith.constant dense<0.000000e+00> : vector<8xf32>
    %9 = vector.multi_reduction <add>, %8, %cst [1] : vector<8x32xf32> to vector<8xf32>
    %10 = vector.shape_cast %9 : vector<8xf32> to vector<8x1xf32>
    %11 = math.sqrt %10 : vector<8x1xf32>
    %12 = arith.mulf %7, %7 : vector<8x32xf32>
    %cst_6 = arith.constant dense<0.000000e+00> : vector<8xf32>
    %13 = vector.multi_reduction <add>, %12, %cst_6 [1] : vector<8x32xf32> to vector<8xf32>
    %14 = vector.shape_cast %13 : vector<8xf32> to vector<8x1xf32>
    %15 = math.sqrt %14 : vector<8x1xf32>
    %16 = arith.subf %11, %15 : vector<8x1xf32>
    %cst_7 = arith.constant 2.000000e-01 : f32
    %17 = vector.broadcast %cst_7 : f32 to vector<8x1xf32>
    %18 = arith.addf %16, %17 : vector<8x1xf32>
    %c1_i32 = arith.constant 1 : i32
    %19 = arith.muli %arg0, %c1_i32 : i32
    %20 = arith.addi %19, %arg1 : i32
    %21 = tpu.iota {dimensions = array<i32: 0>} : vector<8x1xi32>
    %c8_i32 = arith.constant 8 : i32
    %22 = arith.muli %20, %c8_i32 : i32
    %23 = vector.broadcast %22 : i32 to vector<8x1xi32>
    %24 = arith.addi %21, %23 : vector<8x1xi32>
    %cst_8 = arith.constant 0.000000e+00 : f32
    %25 = vector.broadcast %cst_8 : f32 to vector<8x1xf32>
    %26 = arith.cmpf ogt, %18, %25 : vector<8x1xf32>
    %c8_i32_9 = arith.constant 8 : i32
    %27 = vector.broadcast %c8_i32_9 : i32 to vector<8x1xi32>
    %28 = arith.cmpi slt, %24, %27 : vector<8x1xi32>
    %29 = arith.andi %26, %28 : vector<8x1xi1>
    %cst_10 = arith.constant 0.000000e+00 : f32
    %30 = vector.broadcast %cst_10 : f32 to vector<8x1xf32>
    %31 = arith.select %29, %18, %30 : vector<8x1xi1>, vector<8x1xf32>
    %c0_11 = arith.constant 0 : index
    %c0_12 = arith.constant 0 : index
    %c0_13 = arith.constant 0 : index
    %32 = vector.load %arg5[%c0_11, %c0_12, %c0_13] : memref<1x1x1xf32, #tpu.memory_space<vmem>>, vector<1x1x1xf32>
    %33 = vector.shape_cast %31 : vector<8x1xf32> to vector<1x8x1xf32>
    %cst_14 = arith.constant dense<0.000000e+00> : vector<1xf32>
    %34 = vector.multi_reduction <add>, %33, %cst_14 [1, 2] : vector<1x8x1xf32> to vector<1xf32>
    %35 = vector.shape_cast %34 : vector<1xf32> to vector<1x1x1xf32>
    %36 = vector.extract %35[0, 0, 0] : f32 from vector<1x1x1xf32>
    %37 = vector.broadcast %36 : f32 to vector<1x1xf32>
    %38 = vector.shape_cast %37 : vector<1x1xf32> to vector<1x1x1xf32>
    %39 = arith.addf %32, %38 : vector<1x1x1xf32>
    %c0_15 = arith.constant 0 : index
    %c0_16 = arith.constant 0 : index
    %c0_17 = arith.constant 0 : index
    %40 = vector.load %arg5[%c0_15, %c0_16, %c0_17] : memref<1x1x1xf32, #tpu.memory_space<vmem>>, vector<1x1x1xf32>
    tpu.vector_store %arg5[%c0_15, %c0_16, %c0_17], %39 {strides = array<i32>} : memref<1x1x1xf32, #tpu.memory_space<vmem>>, vector<1x1x1xf32>,
    %c0_18 = arith.constant 0 : index
    %c0_19 = arith.constant 0 : index
    %c0_20 = arith.constant 0 : index
    %41 = vector.load %arg6[%c0_18, %c0_19, %c0_20] : memref<1x1x1xf32, #tpu.memory_space<vmem>>, vector<1x1x1xf32>
    %42 = arith.extui %29 : vector<8x1xi1> to vector<8x1xi32>
    %43 = arith.sitofp %42 : vector<8x1xi32> to vector<8x1xf32>
    %44 = vector.shape_cast %43 : vector<8x1xf32> to vector<1x8x1xf32>
    %cst_21 = arith.constant dense<0.000000e+00> : vector<1xf32>
    %45 = vector.multi_reduction <add>, %44, %cst_21 [1, 2] : vector<1x8x1xf32> to vector<1xf32>
    %46 = vector.shape_cast %45 : vector<1xf32> to vector<1x1x1xf32>
    %47 = vector.extract %46[0, 0, 0] : f32 from vector<1x1x1xf32>
    %48 = vector.broadcast %47 : f32 to vector<1x1xf32>
    %49 = vector.shape_cast %48 : vector<1x1xf32> to vector<1x1x1xf32>
    %50 = arith.addf %41, %49 : vector<1x1x1xf32>
    %c0_22 = arith.constant 0 : index
    %c0_23 = arith.constant 0 : index
    %c0_24 = arith.constant 0 : index
    %51 = vector.load %arg6[%c0_22, %c0_23, %c0_24] : memref<1x1x1xf32, #tpu.memory_space<vmem>>, vector<1x1x1xf32>
    tpu.vector_store %arg6[%c0_22, %c0_23, %c0_24], %50 {strides = array<i32>} : memref<1x1x1xf32, #tpu.memory_space<vmem>>, vector<1x1x1xf32>,
    return
  }
  func.func @transform_0(%arg0: i32, %arg1: i32) -> (i32, i32) {
    %c1_i32 = arith.constant 1 : i32
    %0 = arith.muli %arg0, %c1_i32 : i32
    %1 = arith.addi %0, %arg1 : i32
    %c0_i32 = arith.constant 0 : i32
    %2 = arith.minsi %1, %c0_i32 : i32
    %c0_i32_0 = arith.constant 0 : i32
    %c0_i32_1 = arith.constant 0 : i32
    return %2, %c0_i32_0 : i32, i32
  }
  func.func @transform_1(%arg0: i32, %arg1: i32) -> (i32, i32) {
    %c1_i32 = arith.constant 1 : i32
    %0 = arith.muli %arg0, %c1_i32 : i32
    %1 = arith.addi %0, %arg1 : i32
    %c0_i32 = arith.constant 0 : i32
    %2 = arith.minsi %1, %c0_i32 : i32
    %c0_i32_0 = arith.constant 0 : i32
    %c0_i32_1 = arith.constant 0 : i32
    return %2, %c0_i32_0 : i32, i32
  }
  func.func @transform_2(%arg0: i32, %arg1: i32) -> (i32, i32) {
    %c1_i32 = arith.constant 1 : i32
    %0 = arith.muli %arg0, %c1_i32 : i32
    %1 = arith.addi %0, %arg1 : i32
    %c0_i32 = arith.constant 0 : i32
    %2 = arith.minsi %1, %c0_i32 : i32
    %c0_i32_0 = arith.constant 0 : i32
    %c0_i32_1 = arith.constant 0 : i32
    return %2, %c0_i32_0 : i32, i32
  }
  func.func @transform_3(%arg0: i32, %arg1: i32) -> (i32, i32, i32) {
    %c0_i32 = arith.constant 0 : i32
    %c0_i32_0 = arith.constant 0 : i32
    %c0_i32_1 = arith.constant 0 : i32
    return %arg0, %c0_i32, %c0_i32_0 : i32, i32, i32
  }
  func.func @transform_4(%arg0: i32, %arg1: i32) -> (i32, i32, i32) {
    %c0_i32 = arith.constant 0 : i32
    %c0_i32_0 = arith.constant 0 : i32
    %c0_i32_1 = arith.constant 0 : i32
    return %arg0, %c0_i32, %c0_i32_0 : i32, i32, i32
  }
}

</mosaic_0001>

<bundles_post_ra>
// kernel: tpu_custom_call.1
= control target key start
LH: loop header
LB: loop body
LE: loop exit
PB: predicated region body
PF: predicated region fallthrough
CT: control target
= control target key end

     0   :  { %10 = vsyncpa [#allocation3], 0  ;;  %s420_s0 = inlined_call_operand.hbm [shape: f32[8,32], index: 0, kind: input, shape index: {}]   ;;  %s421_s1 = inlined_call_operand.hbm [shape: f32[8,32], index: 1, kind: input, shape index: {}]   ;;  %s422_s2 = inlined_call_operand.hbm [shape: f32[8,32], index: 2, kind: input, shape index: {}]   ;;  %s423_s3 = inlined_call_operand.hbm [shape: f32[1,1,1], index: 3, kind: output, shape index: {0}]   ;;  %s424_s4 = inlined_call_operand.hbm [shape: f32[1,1,1], index: 4, kind: output, shape index: {1}]  }
   0x1   :  { %11 = vsyncpa [#allocation6], 0 }
   0x2   :  { %12 = vsyncpa [#allocation4], 0 }
   0x3   :  { %13 = vsyncpa [#allocation10], 0  ;;  %s325_s15 = smov [#allocation5]   ;;  %s326_s17 = smov [#allocation2]  }
   0x4   :  { %s40_s16 = sshll.u32 %s325_s15, 4  ;;  %s25_s18 = sshll.u32 %s326_s17, 4  ;;  %s41_s16 = int_to_ptr.vmem [resolvable:$true] %s40_s16  ;;  %s26_s18 = int_to_ptr.vmem [resolvable:$true] %s25_s18 }
   0x5   :  { %s207_s21 = scalar_lea.hbm %s421_s1, 128 }
   0x6   :  { %p208_p0 = scmp.ne.s32.totalorder %s421_s1, %s207_s21  ;;  %p211_p1 = scmp.lt.u32.totalorder %s207_s21, %s421_s1 }
   0x8   :  { %p213_p2 = pnand %p211_p1, %p208_p0 }
   0xa   :  { %216 = shalt.err (!%p213_p2)
}
   0xb   :  { %s217_s26 = scalar_lea.vmem %s41_s16, 128  ;;  %p222_p4 = scmp.lt.s32.totalorder %s41_s16, %s41_s16 }
   0xc   :  { %p218_p3 = scmp.ne.s32.totalorder %s41_s16, %s217_s26  ;;  %p223_p5 = scmp.lt.s32.totalorder %s217_s26, %s217_s26 }
   0xe   :  { %p224_p6 = por %p223_p5, %p222_p4 }
  0x10   :  { %p225_p7 = pnand %p224_p6, %p218_p3 }
  0x12   :  { %228 = shalt.err (!%p225_p7)
}
  0x13   :  { %43 = dma.hbm_to_vmem [thread:$0]  %s421_s1, 128, %s41_s16, [#allocation6]  }
  0x14   :  { %s229_s5 = scalar_lea.hbm %s420_s0, 128 }
  0x15   :  { %p230_p8 = scmp.ne.s32.totalorder %s420_s0, %s229_s5  ;;  %p233_p9 = scmp.lt.u32.totalorder %s229_s5, %s420_s0 }
  0x17   :  { %p235_p10 = pnand %p233_p9, %p230_p8 }
  0x19   :  { %238 = shalt.err (!%p235_p10)
}
  0x1a   :  { %s239_s10 = scalar_lea.vmem %s26_s18, 128  ;;  %p244_p12 = scmp.lt.s32.totalorder %s26_s18, %s26_s18 }
  0x1b   :  { %p240_p11 = scmp.ne.s32.totalorder %s26_s18, %s239_s10  ;;  %p245_p13 = scmp.lt.s32.totalorder %s239_s10, %s239_s10 }
  0x1d   :  { %p246_p0 = por %p245_p13, %p244_p12 }
  0x1f   :  { %p247_p1 = pnand %p246_p0, %p240_p11 }
  0x21   :  { %250 = shalt.err (!%p247_p1)
}
  0x22   :  { %28 = dma.hbm_to_vmem [thread:$0]  %s420_s0, 128, %s26_s18, [#allocation3]  }
  0x23   :  { %s327_s12 = smov [#allocation7]   ;;  %s251_s16 = scalar_lea.hbm %s422_s2, 128 }
  0x24   :  { %s55_s13 = sshll.u32 %s327_s12, 4  ;;  %p252_p2 = scmp.ne.s32.totalorder %s422_s2, %s251_s16  ;;  %s56_s13 = int_to_ptr.vmem [resolvable:$true] %s55_s13 }
  0x25   :  { %p255_p3 = scmp.lt.u32.totalorder %s251_s16, %s422_s2 }
  0x27   :  { %p257_p4 = pnand %p255_p3, %p252_p2 }
  0x29   :  { %260 = shalt.err (!%p257_p4)
}
  0x2a   :  { %s261_s22 = scalar_lea.vmem %s56_s13, 128  ;;  %p266_p6 = scmp.lt.s32.totalorder %s56_s13, %s56_s13 }
  0x2b   :  { %p262_p5 = scmp.ne.s32.totalorder %s56_s13, %s261_s22  ;;  %p267_p7 = scmp.lt.s32.totalorder %s261_s22, %s261_s22 }
  0x2d   :  { %p268_p8 = por %p267_p7, %p266_p6 }
  0x2f   :  { %p269_p9 = pnand %p268_p8, %p262_p5 }
  0x31   :  { %272 = shalt.err (!%p269_p9)
}
  0x32   :  { %58 = dma.hbm_to_vmem [thread:$0]  %s422_s2, 128, %s56_s13, [#allocation6]  }
  0x33   :  { %317 = dma.done.wait [#allocation3], 128  }
  0x34   :  { %318 = vsyncadd [#allocation3], 4294967168 }
  0x35   :  { %319 = dma.done.wait [#allocation6], 256  }
  0x36   :  { %320 = vsyncadd [#allocation6], 4294967040  ;;  %v84_v0 = vld [vmem:[#allocation2] sm:$0xff]  ;;  %v85_v1 = vld [vmem:[#allocation5] sm:$0xff]  ;;  %vm90_vm0 = vcmask 261120   ;;  %vm81_vm1 = vcmask 0  }
  0x37   :  { %v86_v2 = vld [vmem:[#allocation7] sm:$0xff]  ;;  %v87_v3 = vsub.f32 %v84_v0, %v85_v1  ;;  %v328_v9 = vmov 0.0   ;;  %vm125_vm6 = vcmask 7168   ;;  %s329_s2 = smov [#allocation8]   ;;  %s330_s25 = smov [#allocation9]  }
  0x38   :  { %v88_v4 = vsub.f32 %v84_v0, %v86_v2  ;;  %82 = vst.msk [vmem:[#allocation8] sm:$0x1] %vm81_vm1, %v328_v9  ;;  %83 = vst.msk [vmem:[#allocation9] sm:$0x1] %vm81_vm1, %v328_v9  ;;  %s162_s23 = sshll.u32 %s329_s2, 4  ;;  %s172_s26 = sshll.u32 %s330_s25, 4  ;;  %s163_s23 = int_to_ptr.vmem [resolvable:$true] %s162_s23  ;;  %s173_s26 = int_to_ptr.vmem [resolvable:$true] %s172_s26 }
  0x39   :  { %v89_v5 = vmul.f32 %v87_v3, %v87_v3  ;;  %s273_s28 = scalar_lea.vmem %s163_s23, 16  ;;  %s277_s29 = scalar_lea.vmem %s163_s23, 32 }
  0x3a   :  { %v101_v6 = vmul.f32 %v88_v4, %v88_v4  ;;  %p274_p10 = scmp.ne.s32.totalorder %s163_s23, %s273_s28  ;;  %p278_p11 = scmp.lt.s32.totalorder %s163_s23, %s163_s23 }
  0x3b   :  { %v91_v7 = vsel %vm90_vm0, %v89_v5, 0.0  ;;  %p279_p12 = scmp.lt.s32.totalorder %s277_s29, %s273_s28 }
  0x3c   :  { %92 = vadd.xlane.f32.xlu0 %v91_v7  ;;  %v102_v8 = vsel %vm90_vm0, %v101_v6, 0.0 }
  0x3d   :  { %p280_p13 = por %p279_p12, %p278_p11 }
  0x3f   :  { %v124_v42 = vld [vmem:[#allocation8] sm:$0x1]  ;;  %v140_v45 = vld [vmem:[#allocation9] sm:$0x1]  ;;  %p281_p0 = pnand %p280_p13, %p274_p10 }
  0x40   :  { %103 = vadd.xlane.f32.xlu0 %v102_v8 }
  0xc9   :  { %v93_v10 = vpop.xlane.xlu0 %92 }
  0xca   :  { %203 = vrsqrt.f32 %v93_v10  ;;  %vm96_vm2 = vcmp.eq.f32.partialorder %v93_v10, inf  ;;  %v99_v18 = vand.u32 2147483648, %v93_v10  ;;  %vm98_vm4 = vcmp.eq.f32.partialorder %v93_v10, 0.0 }
  0xcd   :  { %v104_v11 = vpop.xlane.xlu0 %103 }
  0xce   :  { %205 = vrsqrt.f32 %v104_v11  ;;  %vm107_vm3 = vcmp.eq.f32.partialorder %v104_v11, inf  ;;  %v110_v17 = vand.u32 2147483648, %v104_v11  ;;  %vm109_vm5 = vcmp.eq.f32.partialorder %v104_v11, 0.0 }
  0xd4   :  { %v204_v12 = vpop.eup %203 }
  0xd5   :  { %v95_v13 = vmul.f32 %v204_v12, %v93_v10 }
  0xd7   :  { %v97_v16 = vsel %vm96_vm2, %v93_v10, %v95_v13 }
  0xd8   :  { %v206_v14 = vpop.eup %205  ;;  %v100_v20 = vsel %vm98_vm4, %v99_v18, %v97_v16 }
  0xd9   :  { %v106_v15 = vmul.f32 %v206_v14, %v104_v11 }
  0xdb   :  { %v108_v19 = vsel %vm107_vm3, %v104_v11, %v106_v15 }
  0xdc   :  { %v111_v21 = vsel %vm109_vm5, %v110_v17, %v108_v19 }
  0xdd   :  { %v112_v22 = vsub.f32 %v100_v20, %v111_v21 }
  0xdf   :  { %v113_v23 = vadd.f32 0.2, %v112_v22 }
  0xe1   :  { %vm120_vm7 = vcmp.gt.f32.partialorder %v113_v23, 0.0 }
  0xe2   :  { %v123_v24 = vsel %vm120_vm7, %v113_v23, 0.0  ;;  %v192_v26 = vsel %vm120_vm7, 1.0, %v328_v9 }
  0xe3   :  { %v126_v25 = vsel %vm125_vm6, %v123_v24, 0.0  ;;  %v143_v27 = vsel %vm125_vm6, %v192_v26, 0.0 }
  0xe4   :  { %127 = vadd.xlane.f32.xlu1 %v126_v25 }
  0xe8   :  { %144 = vadd.xlane.f32.xlu1 %v143_v27 }
 0x171   :  { %v128_v28 = vpop.xlane.xlu1 %127 }
 0x172   :  { %v129_v29 = vrot.slane %v128_v28, 4 }
 0x174   :  { %v130_v30 = vadd.f32 %v129_v29, %v128_v28 }
 0x175   :  { %v145_v31 = vpop.xlane.xlu1 %144 }
 0x176   :  { %v131_v32 = vrot.slane %v130_v30, 2  ;;  %v146_v33 = vrot.slane %v145_v31, 4 }
 0x178   :  { %v147_v34 = vadd.f32 %v146_v33, %v145_v31  ;;  %v132_v35 = vadd.f32 %v131_v32, %v130_v30 }
 0x17a   :  { %v148_v36 = vrot.slane %v147_v34, 2  ;;  %v133_v37 = vrot.slane %v132_v35, 1 }
 0x17c   :  { %v149_v38 = vadd.f32 %v148_v36, %v147_v34  ;;  %v134_v39 = vadd.f32 %v133_v37, %v132_v35 }
 0x17e   :  { %193 = vpush %v134_v39  ;;  %v150_v40 = vrot.slane %v149_v38, 1 }
 0x180   :  { %v151_v41 = vadd.f32 %v150_v40, %v149_v38 }
 0x182   :  { %195 = vpush %v151_v41 }
 0x1af   :  { %s194_s24 = spop %193 }
 0x1b0   :  { %v136_v43 = vstv %s194_s24 }
 0x1b1   :  { %v137_v44 = vadd.f32 %v136_v43, %v124_v42 }
 0x1b3   :  { %139 = vst.msk [vmem:[#allocation8] sm:$0x1] %vm81_vm1, %v137_v44  ;;  %s196_s27 = spop %195 }
 0x1b4   :  { %v153_v46 = vstv %s196_s27 }
 0x1b5   :  { %284 = shalt.err (!%p281_p0)
}
 0x1b6   :  { %s285_s6 = scalar_lea.hbm %s423_s3, 16 }
 0x1b7   :  { %p286_p1 = scmp.ne.s32.totalorder %s423_s3, %s285_s6  ;;  %p289_p2 = scmp.lt.u32.totalorder %s285_s6, %s423_s3 }
 0x1b9   :  { %p291_p3 = pnand %p289_p2, %p286_p1 }
 0x1bb   :  { %294 = shalt.err (!%p291_p3)
}
 0x1bc   :  { %165 = dma.vmem_to_hbm [thread:$0]  %s163_s23, 16, %s423_s3, [#allocation4]   ;;  %v154_v47 = vadd.f32 %v153_v46, %v140_v45 }
 0x1bd   :  { %s295_s12 = scalar_lea.vmem %s173_s26, 16  ;;  %s299_s13 = scalar_lea.vmem %s173_s26, 32 }
 0x1be   :  { %155 = vst.msk [vmem:[#allocation9] sm:$0x1] %vm81_vm1, %v154_v47  ;;  %p296_p4 = scmp.ne.s32.totalorder %s173_s26, %s295_s12  ;;  %p300_p5 = scmp.lt.s32.totalorder %s173_s26, %s173_s26 }
 0x1bf   :  { %p301_p6 = scmp.lt.s32.totalorder %s299_s13, %s295_s12 }
 0x1c1   :  { %p302_p7 = por %p301_p6, %p300_p5 }
 0x1c3   :  { %p303_p8 = pnand %p302_p7, %p296_p4 }
 0x1c5   :  { %306 = shalt.err (!%p303_p8)
}
 0x1c6   :  { %s307_s16 = scalar_lea.hbm %s424_s4, 16 }
 0x1c7   :  { %p308_p9 = scmp.ne.s32.totalorder %s424_s4, %s307_s16  ;;  %p311_p10 = scmp.lt.u32.totalorder %s307_s16, %s424_s4 }
 0x1c9   :  { %p313_p11 = pnand %p311_p10, %p308_p9 }
 0x1cb   :  { %316 = shalt.err (!%p313_p11)
}
 0x1cc   :  { %175 = dma.vmem_to_hbm [thread:$0]  %s173_s26, 16, %s424_s4, [#allocation10]  }
 0x1cd   :  { %321 = dma.done.wait [#allocation4], 16  }
 0x1ce   :  { %322 = vsyncadd [#allocation4], 4294967280 }
 0x1cf   :  { %323 = dma.done.wait [#allocation10], 16  }
 0x1d0   :  { %324 = vsyncadd [#allocation10], 4294967280 }
 0x1d1   :  { %182 = vsyncpa [#allocation3], 1 }
 0x1d2   :  { %183 = vsyncpa [#allocation6], 1 }
 0x1d3   :  { %184 = vsyncpa [#allocation4], 1 }
 0x1d4   :  { %185 = vsyncpa [#allocation10], 1 }

</bundles_post_ra>
